<compile_context>
chip_gen: v7x
topology: tpu7x:2x2x1
jax: 0.10.0
libtpu: 0.0.40
codegen_flags: <defaults>
</compile_context>

<pallas_src>
import math

import jax
import jax.numpy as jnp
from jax.experimental import pallas as pl
from jax.experimental.pallas import tpu as pltpu


def _build_pe_table(d_model: int, vocab_size: int = 5000) -> jnp.ndarray:
    """Sinusoidal PE buffer, matching torch's pe[:,0::2]=sin, pe[:,1::2]=cos."""
    assert d_model % 2 == 0, "sinusoidal PE interleave requires even d_model"
    position = jnp.arange(vocab_size, dtype=jnp.float32)[:, None]            # [V, 1]
    div_term = jnp.exp(
        jnp.arange(0, d_model, 2, dtype=jnp.float32)
        * (-math.log(10000.0) / d_model)
    )                                                                         # [D/2]
    angles = position * div_term                                              # [V, D/2]
    pe = jnp.stack([jnp.sin(angles), jnp.cos(angles)], axis=-1)               # [V, D/2, 2]
    return pe.reshape(vocab_size, d_model)                                    # [V, D]


def _pe_add_kernel(x_ref, pe_ref, o_ref):
    # x_ref / o_ref: (tile_b, tile_sd); pe_ref: (1, tile_sd)
    # Sublane-broadcast add; last dim is lane-dense (full extent or k*128),
    # so loads/stores are unmasked full-width vld/vst.
    o_ref[...] = x_ref[...] + pe_ref[...]


_TARGET_BLOCK_BYTES = 2 * 1024 * 1024     # per-block budget for x / out blocks
_LANE_TILE_MAX = 64 * 1024                # max tile along flattened S*D (k*128)
_VMEM_LIMIT_BYTES = 32 * 1024 * 1024      # explicit scoped-VMEM limit (all gens)


def positional_encoding_forward(x: jnp.ndarray, pe: jnp.ndarray,
                                *, donate_x: bool = False) -> jnp.ndarray:
    """x: [B, S, D]; pe: [vocab_size, D]. Returns x + pe[None, :S, :]."""
    B, S, D = x.shape
    sd = S * D
    itemsize = jnp.dtype(x.dtype).itemsize
    sublane = {4: 8, 2: 16, 1: 32}.get(itemsize, 8)

    # Lane-dense flattening: collapse (S, D) into the last axis.  These
    # reshapes are contiguous (row-major) and lower to bitcasts under jit.
    x_flat = x.reshape(B, sd)
    pe_flat = pe[:S, :].astype(x.dtype).reshape(1, sd)

    # Tile the flattened axis: full extent if small, else a large multiple of 128.
    tile_sd = sd if sd <= _LANE_TILE_MAX else _LANE_TILE_MAX
    # Tile the batch axis to hit ~_TARGET_BLOCK_BYTES per block (rounded to a
    # sublane multiple so partial-extent blocks keep legal (8,128) tiling).
    rows_target = max(1, _TARGET_BLOCK_BYTES // (tile_sd * itemsize))
    if rows_target >= B:
        tile_b = B                                      # full extent (exempt)
    else:
        tile_b = min(B, max(sublane, (rows_target // sublane) * sublane))

    # sd-tiles outer, batch-tiles inner: the pe block index is constant over
    # the inner loop, so its DMA is skipped on revisits; both axes parallel
    # so megacore (v7x 2-TC) shards the grid.
    grid = (pl.cdiv(sd, tile_sd), pl.cdiv(B, tile_b))

    out_flat = pl.pallas_call(
        _pe_add_kernel,
        out_shape=jax.ShapeDtypeStruct((B, sd), x.dtype),
        grid_spec=pltpu.PrefetchScalarGridSpec(
            num_scalar_prefetch=0,
            grid=grid,
            in_specs=[
                pl.BlockSpec((tile_b, tile_sd), lambda j, b: (b, j)),
                pl.BlockSpec((1, tile_sd), lambda j, b: (0, j)),
            ],
            out_specs=pl.BlockSpec((tile_b, tile_sd), lambda j, b: (b, j)),
        ),
        compiler_params=pltpu.CompilerParams(
            dimension_semantics=("parallel", "parallel"),
            vmem_limit_bytes=_VMEM_LIMIT_BYTES,
        ),
        input_output_aliases={0: 0} if donate_x else {},
    )(x_flat, pe_flat)

    return out_flat.reshape(B, S, D)


if __name__ == "__main__":
    # Small shapes consistent with the module: batch=2, seq=8, d_model=32
    B, S, D = 2, 8, 32
    vocab_size = 5000

    key = jax.random.PRNGKey(0)
    x = jax.random.normal(key, (B, S, D), dtype=jnp.float32)
    pe = _build_pe_table(D, vocab_size)

    fwd = jax.jit(lambda x_, pe_: positional_encoding_forward(x_, pe_))
    out = jax.block_until_ready(fwd(x, pe))

    # Sanity check against a pure-JAX reference
    ref = x + pe[None, :S, :]
    assert out.shape == (B, S, D)
    assert jnp.allclose(out, ref, atol=1e-6), "mismatch vs reference"

    print("KERNEL_OK")
</pallas_src>

<mosaic_0001>
module attributes {stable_mosaic.version = 11 : i64} {
  func.func @_pe_add_kernel(%arg0: i32, %arg1: i32, %arg2: memref<2x256xf32, #tpu.memory_space<vmem>>, %arg3: memref<1x256xf32, #tpu.memory_space<vmem>>, %arg4: memref<2x256xf32, #tpu.memory_space<vmem>>) attributes {dimension_semantics = [#tpu.dimension_semantics<parallel>, #tpu.dimension_semantics<parallel>], iteration_bounds = array<i64: 1, 1>, scalar_prefetch = 0 : i64, scratch_operands = 0 : i64, tpu.core_type = #tpu.core_type<tc>, window_params = [{transform_indices = @transform_0, window_bounds = array<i64: 2, 256>}, {transform_indices = @transform_1, window_bounds = array<i64: 1, 256>}, {transform_indices = @transform_2, window_bounds = array<i64: 2, 256>}]} {
    %c0 = arith.constant 0 : index
    %c0_0 = arith.constant 0 : index
    %0 = vector.load %arg2[%c0, %c0_0] : memref<2x256xf32, #tpu.memory_space<vmem>>, vector<2x256xf32>
    %c0_1 = arith.constant 0 : index
    %c0_2 = arith.constant 0 : index
    %1 = vector.load %arg3[%c0_1, %c0_2] : memref<1x256xf32, #tpu.memory_space<vmem>>, vector<1x256xf32>
    %2 = vector.broadcast %1 : vector<1x256xf32> to vector<2x256xf32>
    %3 = arith.addf %0, %2 : vector<2x256xf32>
    %c0_3 = arith.constant 0 : index
    %c0_4 = arith.constant 0 : index
    %4 = vector.load %arg4[%c0_3, %c0_4] : memref<2x256xf32, #tpu.memory_space<vmem>>, vector<2x256xf32>
    tpu.vector_store %arg4[%c0_3, %c0_4], %3 {strides = array<i32>} : memref<2x256xf32, #tpu.memory_space<vmem>>, vector<2x256xf32>,
    return
  }
  func.func @transform_0(%arg0: i32, %arg1: i32) -> (i32, i32) {
    %c0_i32 = arith.constant 0 : i32
    return %arg1, %arg0 : i32, i32
  }
  func.func @transform_1(%arg0: i32, %arg1: i32) -> (i32, i32) {
    %c0_i32 = arith.constant 0 : i32
    %c0_i32_0 = arith.constant 0 : i32
    return %c0_i32, %arg0 : i32, i32
  }
  func.func @transform_2(%arg0: i32, %arg1: i32) -> (i32, i32) {
    %c0_i32 = arith.constant 0 : i32
    return %arg1, %arg0 : i32, i32
  }
}

</mosaic_0001>

<bundles_post_ra>
// kernel: _lambda_.1
= control target key start
LH: loop header
LB: loop body
LE: loop exit
PB: predicated region body
PF: predicated region fallthrough
CT: control target
= control target key end

     0   :  { %v14_v0 = vlaneseq  ;;  %v38_v1 = vmov 1983009808   ;;  %s63_s1 = inlined_call_operand.vmem [shape: f32[1,256], index: 1, kind: input, shape index: {}]   ;;  %s64_s0 = inlined_call_operand.vmem [shape: f32[2,256], index: 0, kind: input, shape index: {}]   ;;  %s65_s2 = inlined_call_operand.vmem [shape: f32[2,256], index: 2, kind: output, shape index: {}]  }
   0x1   :  { %v24_v2 = vunpack.c.l.s4 %v38_v1  ;;  %v12_v4 = vld [vmem:[%s63_s1] sm:$0x3] }
   0x2   :  { %v15_v3 = vshrl.u32 %v14_v0, 7  ;;  %v11_v12 = vld [vmem:[%s64_s0] sm:$0xf] }
   0x3   :  { %v25_v5 = vunpack.c.0.s8 %v24_v2 }
   0x4   :  { %v16_v6 = vsub.s32 0, %v15_v3  ;;  %v20_v7 = vsub.s32 1, %v15_v3 }
   0x5   :  { %v28_v10 = vsub.s32 %v25_v5, %v15_v3 }
   0x6   :  { %v17_v8 = vrot.slane %v12_v4, %v16_v6  ;;  %v21_v9 = vrot.slane %v12_v4, %v20_v7 }
   0x8   :  { %v22_v11 = vcombine.low %v17_v8, %v21_v9 }
   0xa   :  { %v29_v13 = vrot.slane %v22_v11, %v28_v10 }
   0xc   :  { %v31_v14 = vadd.f32 %v29_v13, %v11_v12 }
   0xe   :  { %32 = vst [vmem:[%s65_s2] sm:$0xf] %v31_v14 }

</bundles_post_ra>
